<compile_context>
chip_gen: v6e
topology: v6e:2x2x1
jax: 0.10.0
libtpu: 0.0.40
codegen_flags: <defaults>
</compile_context>

<pallas_src>
import jax
import jax.numpy as jnp
from jax import lax
from jax.experimental import pallas as pl
from jax.experimental.pallas import tpu as pltpu

_LANE = 128


def _round_up(x, m):
    return ((x + m - 1) // m) * m


def _linear_kernel(x_ref, w_ref, b_ref, o_ref):
    d_out = o_ref.shape[-1]
    # In-kernel f32 -> bf16 cast of the streamed x tile (VPU work, hidden under
    # the x DMA); the weight is already bf16 from init-time prep.
    x_bf16 = x_ref[...].astype(jnp.bfloat16)
    z = lax.dot_general(
        x_bf16, w_ref[...],
        dimension_numbers=(((1,), (1,)), ((), ())),   # NT matmul, no transpose
        preferred_element_type=jnp.float32,           # f32 accumulation
    )
    # Keep only the real output columns and add the f32 bias (broadcast rows).
    o_ref[...] = z[:, :d_out] + b_ref[...]


def prepare_softmax_params(weight, bias):
    """One-time parameter prep (lives at module-init time, not per forward).

    weight: (D_out, D_in) f32 -> (round_up(D_out,128), D_in) bf16, zero row pad
    bias:   (D_out,)      f32 -> (1, D_out) f32
    """
    d_out, d_in = weight.shape
    d_out_p = _round_up(d_out, _LANE)
    w_p = jnp.zeros((d_out_p, d_in), jnp.bfloat16).at[:d_out, :].set(
        weight.astype(jnp.bfloat16))
    b2d = bias.reshape(1, d_out).astype(jnp.float32)
    # NOTE: D_in=784 is left un-padded (not a multiple of 128): padding x to 896
    # would cost an extra per-call HBM pass over the dominant input, while the
    # ~2% extra MXU passes are invisible behind DMA on this mem-bound kernel.
    return w_p, b2d


def softmax_module_forward(x, w_p, b2d, *, tm=None):
    """Forward of the `SoftMax` module (== nn.Linear): z = x @ W.T + b.

    x:   (B, D_in)          float32
    w_p: (D_out_pad, D_in)  bfloat16   (from prepare_softmax_params)
    b2d: (1, D_out)         float32    (from prepare_softmax_params)
    returns (B, D_out)      float32
    """
    B, D_in = x.shape
    d_out_p, _ = w_p.shape
    D_out = b2d.shape[1]

    if tm is None:
        # Big tiles amortize the ~0.35 us/step grid overhead, but keep >= 2
        # grid tiles when B allows it so v7x can shard across both TensorCores.
        # Rounded to 16 (bf16 sublane packing of the in-kernel-casted x tile).
        tm = max(16, min(1024, _round_up(pl.cdiv(B, 2), 16)))

    out = pl.pallas_call(
        _linear_kernel,
        out_shape=jax.ShapeDtypeStruct((B, D_out), jnp.float32),
        grid_spec=pltpu.PrefetchScalarGridSpec(
            num_scalar_prefetch=0,
            grid=(pl.cdiv(B, tm),),     # ragged last block handled by Pallas
            in_specs=[
                # x streams as f32 (TM, D_in) blocks, double-buffered.
                pl.BlockSpec((tm, D_in), lambda i: (i, 0)),
                # Weight / bias are grid-invariant -> VMEM-resident, 1 buffer.
                pl.BlockSpec((d_out_p, D_in), lambda i: (0, 0),
                             pipeline_mode=pl.Buffered(1)),
                pl.BlockSpec((1, D_out), lambda i: (0, 0),
                             pipeline_mode=pl.Buffered(1)),
            ],
            out_specs=pl.BlockSpec((tm, D_out), lambda i: (i, 0)),
        ),
        compiler_params=pltpu.CompilerParams(
            dimension_semantics=("parallel",),   # shard batch tiles across TCs
            vmem_limit_bytes=32 * 1024 * 1024,   # explicit; safe on v5e/v6e/v7x
        ),
    )(x, w_p, b2d)
    # TODO(synk): on v7x an upstream-provided fp8 activation path would halve
    # the dominant x HBM read again; not applicable on v5e/v6e, so not done here.
    return out


if __name__ == "__main__":
    # MNIST-style SoftMax classifier: input_size = 28*28 = 784, output_size = 10.
    input_size = 784
    output_size = 10

    key = jax.random.PRNGKey(0)
    kx, kw, kb, kx2 = jax.random.split(key, 4)

    # Deterministic init (mimics nn.Linear's U(-1/sqrt(fan_in), 1/sqrt(fan_in))).
    bound = 1.0 / jnp.sqrt(jnp.float32(input_size))
    weight = jax.random.uniform(kw, (output_size, input_size), jnp.float32,
                                minval=-bound, maxval=bound)
    bias = jax.random.uniform(kb, (output_size,), jnp.float32,
                              minval=-bound, maxval=bound)

    # One-time parameter prep (init-time, not per forward call).
    w_p, b2d = prepare_softmax_params(weight, bias)

    def check(batch, kk):
        x = jax.random.normal(kk, (batch, input_size), jnp.float32)
        z = jax.block_until_ready(softmax_module_forward(x, w_p, b2d))
        z_ref = x @ weight.T + bias
        assert z.shape == (batch, output_size)
        # bf16 matmul inputs with f32 accumulation -> bf16-level tolerance.
        assert jnp.allclose(z, z_ref, atol=2e-2, rtol=2e-2), (
            float(jnp.max(jnp.abs(z - z_ref))))

    check(8, kx)    # single ragged tile (B < TM)
    check(50, kx2)  # multi-tile grid with a ragged last block

    print("KERNEL_OK")
</pallas_src>

<mosaic_0001>
module attributes {stable_mosaic.version = 11 : i64} {
  func.func @_linear_kernel(%arg0: i32, %arg1: memref<16x784xf32, #tpu.memory_space<vmem>>, %arg2: memref<128x784xbf16, #tpu.memory_space<vmem>>, %arg3: memref<1x10xf32, #tpu.memory_space<vmem>>, %arg4: memref<16x10xf32, #tpu.memory_space<vmem>>) attributes {dimension_semantics = [#tpu.dimension_semantics<parallel>], iteration_bounds = array<i64: 1>, scalar_prefetch = 0 : i64, scratch_operands = 0 : i64, tpu.core_type = #tpu.core_type<tc>, window_params = [{transform_indices = @transform_0, window_bounds = array<i64: 16, 784>}, {pipeline_mode = #tpu.pipeline_mode<synchronous>, transform_indices = @transform_1, window_bounds = array<i64: 128, 784>}, {pipeline_mode = #tpu.pipeline_mode<synchronous>, transform_indices = @transform_2, window_bounds = array<i64: 1, 10>}, {transform_indices = @transform_3, window_bounds = array<i64: 16, 10>}]} {
    %c0 = arith.constant 0 : index
    %c0_0 = arith.constant 0 : index
    %0 = vector.load %arg1[%c0, %c0_0] : memref<16x784xf32, #tpu.memory_space<vmem>>, vector<16x784xf32>
    %1 = arith.truncf %0 : vector<16x784xf32> to vector<16x784xbf16>
    %c0_1 = arith.constant 0 : index
    %c0_2 = arith.constant 0 : index
    %2 = vector.load %arg2[%c0_1, %c0_2] : memref<128x784xbf16, #tpu.memory_space<vmem>>, vector<128x784xbf16>
    %cst = arith.constant dense<0.000000e+00> : vector<16x128xf32>
    %3 = tpu.matmul %1, %2, %cst {dimension_numbers = #tpu.dot_dimension_numbers<[1], [1], [0], [0], [0, 0, 1, 0], [], []>} : vector<16x784xbf16>, vector<128x784xbf16>, vector<16x128xf32> -> vector<16x128xf32>
    %4 = vector.extract_strided_slice %3 {offsets = [0, 0], sizes = [16, 10], strides = [1, 1]} : vector<16x128xf32> to vector<16x10xf32>
    %c0_3 = arith.constant 0 : index
    %c0_4 = arith.constant 0 : index
    %5 = vector.load %arg3[%c0_3, %c0_4] : memref<1x10xf32, #tpu.memory_space<vmem>>, vector<1x10xf32>
    %6 = vector.broadcast %5 : vector<1x10xf32> to vector<16x10xf32>
    %7 = arith.addf %4, %6 : vector<16x10xf32>
    %c0_5 = arith.constant 0 : index
    %c0_6 = arith.constant 0 : index
    %8 = vector.load %arg4[%c0_5, %c0_6] : memref<16x10xf32, #tpu.memory_space<vmem>>, vector<16x10xf32>
    tpu.vector_store %arg4[%c0_5, %c0_6], %7 {strides = array<i32>} : memref<16x10xf32, #tpu.memory_space<vmem>>, vector<16x10xf32>,
    return
  }
  func.func @transform_0(%arg0: i32) -> (i32, i32) {
    %c0_i32 = arith.constant 0 : i32
    %c0_i32_0 = arith.constant 0 : i32
    return %arg0, %c0_i32 : i32, i32
  }
  func.func @transform_1(%arg0: i32) -> (i32, i32) {
    %c0_i32 = arith.constant 0 : i32
    %c0_i32_0 = arith.constant 0 : i32
    %c0_i32_1 = arith.constant 0 : i32
    return %c0_i32, %c0_i32_0 : i32, i32
  }
  func.func @transform_2(%arg0: i32) -> (i32, i32) {
    %c0_i32 = arith.constant 0 : i32
    %c0_i32_0 = arith.constant 0 : i32
    %c0_i32_1 = arith.constant 0 : i32
    return %c0_i32, %c0_i32_0 : i32, i32
  }
  func.func @transform_3(%arg0: i32) -> (i32, i32) {
    %c0_i32 = arith.constant 0 : i32
    %c0_i32_0 = arith.constant 0 : i32
    return %arg0, %c0_i32 : i32, i32
  }
}

</mosaic_0001>

<bundles_post_ra>
// kernel: tpu_custom_call.1
= control target key start
LH: loop header
LB: loop body
LE: loop exit
PB: predicated region body
PF: predicated region fallthrough
CT: control target
= control target key end

     0   :  { %8 = vsyncpa [#allocation3], 0  ;;  %v795_v43 = vmov 0.0   ;;  %vm381_vm0 = vcmask 130048   ;;  %vm796_vm1 = vmmov 0   ;;  %vm582_vm2 = vcmask 80896   ;;  %s1054_s0 = inlined_call_operand.vmem [shape: f32[8,784], index: 0, kind: input, shape index: {}]   ;;  %s1055_s1 = inlined_call_operand.vmem [shape: bf16[128,784], index: 1, kind: input, shape index: {}]   ;;  %s1056_s2 = inlined_call_operand.vmem [shape: f32[1,10], index: 2, kind: input, shape index: {}]   ;;  %s1057_s3 = inlined_call_operand.hbm [shape: f32[8,10], index: 3, kind: output, shape index: {}]  }
   0x1   :  { %v693_v0 = vld [vmem:[%s1055_s1 + $0x18c] ss:$28 sps:$4 sm:$0xff]   ;;  %v695_v1 = vld [vmem:[%s1055_s1 + $0x194] ss:$28 sps:$4 sm:$0xff]   ;;  %v701_v5 = vld [vmem:[%s1055_s1 + $0x15c] ss:$28 sps:$4 sm:$0xff]  }
   0x2   :  { %v697_v2 = vld [vmem:[%s1055_s1 + $0x188] ss:$28 sps:$4 sm:$0xff]   ;;  %v698_v3 = vld [vmem:[%s1055_s1 + $0x190] ss:$28 sps:$4 sm:$0xff]   ;;  %409 = vmatprep.subr.bf16.mxu0 %v693_v0  ;;  %450 = vmatprep.subr.bf16.mxu1 %v695_v1  ;;  %v704_v7 = vld [vmem:[%s1055_s1 + $0x158] ss:$28 sps:$4 sm:$0xff]  }
   0x3   :  { %v699_v4 = vld [vmem:[%s1055_s1 + $0x154] ss:$28 sps:$4 sm:$0xff]   ;;  %410 = vmatpush1.bf16.xpose.msra.mxu0 %v697_v2  ;;  %451 = vmatpush1.bf16.xpose.msra.mxu1 %v698_v3  ;;  %v705_v8 = vld [vmem:[%s1055_s1 + $0x11c] ss:$28 sps:$4 sm:$0xff]   ;;  %v707_v9 = vld [vmem:[%s1055_s1 + $0x124] ss:$28 sps:$4 sm:$0xff]  }
   0x4   :  { %411 = vmatprep.subr.bf16.mxu0 %v699_v4  ;;  %452 = vmatprep.subr.bf16.mxu1 %v701_v5  ;;  %v703_v6 = vld [vmem:[%s1055_s1 + $0x150] ss:$28 sps:$4 sm:$0xff]   ;;  %v709_v10 = vld [vmem:[%s1055_s1 + $0x118] ss:$28 sps:$4 sm:$0xff]   ;;  %v710_v11 = vld [vmem:[%s1055_s1 + $0x120] ss:$28 sps:$4 sm:$0xff]  }
   0x5   :  { %v711_v12 = vld [vmem:[%s1055_s1 + $0xe4] ss:$28 sps:$4 sm:$0xff]   ;;  %v713_v13 = vld [vmem:[%s1055_s1 + $0xec] ss:$28 sps:$4 sm:$0xff]   ;;  %v19_v16 = vld [vmem:[%s1054_s0 + $0x18] sm:$0xff] }
   0x6   :  { %v17_v14 = vld [vmem:[%s1054_s0 + $0x8] sm:$0xff]  ;;  %v24_v15 = vld [vmem:[%s1054_s0 + $0x40] sm:$0xff]  ;;  %v26_v17 = vld [vmem:[%s1054_s0 + $0x50] sm:$0xff] }
   0x7   :  { %v31_v18 = vpack.c.bf16 %v24_v15, %v17_v14  ;;  %v33_v19 = vpack.c.bf16 %v26_v17, %v19_v16  ;;  %v715_v20 = vld [vmem:[%s1055_s1 + $0xe0] ss:$28 sps:$4 sm:$0xff]   ;;  %v716_v21 = vld [vmem:[%s1055_s1 + $0xe8] ss:$28 sps:$4 sm:$0xff]   ;;  %v719_v23 = vld [vmem:[%s1055_s1 + $0xb4] ss:$28 sps:$4 sm:$0xff]  }
   0x8   :  { %v717_v22 = vld [vmem:[%s1055_s1 + $0xac] ss:$28 sps:$4 sm:$0xff]   ;;  %v723_v26 = vld [vmem:[%s1055_s1 + $0x74] ss:$28 sps:$4 sm:$0xff]   ;;  %v725_v27 = vld [vmem:[%s1055_s1 + $0x7c] ss:$28 sps:$4 sm:$0xff]  }
   0x9   :  { %441 = vmatprep.mubr.bf16.mxu0 %v31_v18  ;;  %482 = vmatprep.mubr.bf16.mxu1 %v33_v19  ;;  %v721_v24 = vld [vmem:[%s1055_s1 + $0xa8] ss:$28 sps:$4 sm:$0xff]   ;;  %v722_v25 = vld [vmem:[%s1055_s1 + $0xb0] ss:$28 sps:$4 sm:$0xff]   ;;  %v728_v29 = vld [vmem:[%s1055_s1 + $0x78] ss:$28 sps:$4 sm:$0xff]  }
   0xa   :  { %v727_v28 = vld [vmem:[%s1055_s1 + $0x70] ss:$28 sps:$4 sm:$0xff]   ;;  %v729_v30 = vld [vmem:[%s1055_s1 + $0x3c] ss:$28 sps:$4 sm:$0xff]   ;;  %v731_v31 = vld [vmem:[%s1055_s1 + $0x44] ss:$28 sps:$4 sm:$0xff]  }
   0xb   :  { %412 = vmatpush1.bf16.xpose.msra.mxu0 %v703_v6  ;;  %453 = vmatpush1.bf16.xpose.msra.mxu1 %v704_v7  ;;  %v733_v32 = vld [vmem:[%s1055_s1 + $0x38] ss:$28 sps:$4 sm:$0xff]   ;;  %v734_v33 = vld [vmem:[%s1055_s1 + $0x40] ss:$28 sps:$4 sm:$0xff]   ;;  %v737_v35 = vld [vmem:[%s1055_s1 + $0xc] ss:$28 sps:$4 sm:$0xff]  }
   0xc   :  { %413 = vmatprep.subr.bf16.mxu0 %v705_v8  ;;  %454 = vmatprep.subr.bf16.mxu1 %v707_v9  ;;  %v735_v34 = vld [vmem:[%s1055_s1 + $0x4] ss:$28 sps:$4 sm:$0xff]   ;;  %v743_v38 = vld [vmem:[%s1055_s1 + $0x19c] ss:$28 sps:$4 sm:$0xff]   ;;  %v18_v41 = vld [vmem:[%s1054_s0 + $0x10] sm:$0xff] }
   0xd   :  { %v739_v36 = vld [vmem:[%s1055_s1] ss:$28 sps:$4 sm:$0xff]   ;;  %v740_v37 = vld [vmem:[%s1055_s1 + $0x8] ss:$28 sps:$4 sm:$0xff]   ;;  %v741_v49 = vld [vmem:[%s1055_s1 + $0x198] ss:$28 sps:$4 sm:$0xff]  }
   0xe   :  { %v16_v39 = vld [vmem:[%s1054_s0] sm:$0xff]  ;;  %v23_v40 = vld [vmem:[%s1054_s0 + $0x38] sm:$0xff]  ;;  %v25_v42 = vld [vmem:[%s1054_s0 + $0x48] sm:$0xff] }
   0xf   :  { %v744_v44 = vld [vmem:[%s1055_s1 + $0x1a0] ss:$28 sps:$4 sm:$0xff]   ;;  %v30_v45 = vpack.c.bf16 %v23_v40, %v16_v39  ;;  %v21_v46 = vld [vmem:[%s1054_s0 + $0x28] sm:$0xff]  ;;  %v32_v48 = vpack.c.bf16 %v25_v42, %v18_v41  ;;  %v755_v59 = vld [vmem:[%s1055_s1 + $0xf4] ss:$28 sps:$4 sm:$0xff]  }
  0x10   :  { %v28_v47 = vld [vmem:[%s1054_s0 + $0x60] sm:$0xff]  ;;  %v407_v51 = vsel %vm381_vm0, %v744_v44, 0  ;;  %v751_v55 = vld [vmem:[%s1055_s1 + $0x12c] ss:$28 sps:$4 sm:$0xff]   ;;  %v756_v61 = vld [vmem:[%s1055_s1 + $0xf8] ss:$28 sps:$4 sm:$0xff]  }
  0x11   :  { %v747_v50 = vld [vmem:[%s1055_s1 + $0x164] ss:$28 sps:$4 sm:$0xff]   ;;  %v35_v52 = vpack.c.bf16 %v28_v47, %v21_v46  ;;  %v752_v57 = vld [vmem:[%s1055_s1 + $0x130] ss:$28 sps:$4 sm:$0xff]   ;;  %v759_v63 = vld [vmem:[%s1055_s1 + $0xbc] ss:$28 sps:$4 sm:$0xff]  }
  0x12   :  { %v748_v53 = vld [vmem:[%s1055_s1 + $0x168] ss:$28 sps:$4 sm:$0xff]   ;;  %v745_v54 = vld [vmem:[%s1055_s1 + $0x160] ss:$28 sps:$4 sm:$0xff]   ;;  %v401_v60 = vsel %vm381_vm0, %v752_v57, 0  ;;  %v398_v0 = vsel %vm381_vm0, %v756_v61, 0 }
  0x13   :  { %414 = vmatpush1.bf16.xpose.msra.mxu0 %v709_v10  ;;  %455 = vmatpush1.bf16.xpose.msra.mxu1 %v710_v11  ;;  %v404_v56 = vsel %vm381_vm0, %v748_v53, 0  ;;  %v749_v58 = vld [vmem:[%s1055_s1 + $0x128] ss:$28 sps:$4 sm:$0xff]   ;;  %v753_v62 = vld [vmem:[%s1055_s1 + $0xf0] ss:$28 sps:$4 sm:$0xff]   ;;  %v27_v17 = vld [vmem:[%s1054_s0 + $0x58] sm:$0xff] }
  0x14   :  { %415 = vmatprep.subr.bf16.mxu0 %v711_v12  ;;  %456 = vmatprep.subr.bf16.mxu1 %v713_v13  ;;  %v760_v1 = vld [vmem:[%s1055_s1 + $0xc0] ss:$28 sps:$4 sm:$0xff]   ;;  %v757_v2 = vld [vmem:[%s1055_s1 + $0xb8] ss:$28 sps:$4 sm:$0xff]   ;;  %v764_v5 = vld [vmem:[%s1055_s1 + $0x88] ss:$28 sps:$4 sm:$0xff]  }
  0x15   :  { %v763_v3 = vld [vmem:[%s1055_s1 + $0x84] ss:$28 sps:$4 sm:$0xff]   ;;  %v395_v4 = vsel %vm381_vm0, %v760_v1, 0  ;;  %v767_v7 = vld [vmem:[%s1055_s1 + $0x4c] ss:$28 sps:$4 sm:$0xff]   ;;  %v392_v8 = vsel %vm381_vm0, %v764_v5, 0 }
  0x16   :  { %v761_v6 = vld [vmem:[%s1055_s1 + $0x80] ss:$28 sps:$4 sm:$0xff]   ;;  %v768_v9 = vld [vmem:[%s1055_s1 + $0x50] ss:$28 sps:$4 sm:$0xff]   ;;  %v765_v10 = vld [vmem:[%s1055_s1 + $0x48] ss:$28 sps:$4 sm:$0xff]  }
  0x17   :  { %v771_v11 = vld [vmem:[%s1055_s1 + $0x14] ss:$28 sps:$4 sm:$0xff]   ;;  %v389_v12 = vsel %vm381_vm0, %v768_v9, 0  ;;  %v20_v16 = vld [vmem:[%s1054_s0 + $0x20] sm:$0xff]  ;;  %v29_v19 = vld [vmem:[%s1054_s0 + $0x68] sm:$0xff] }
  0x18   :  { %v772_v13 = vld [vmem:[%s1055_s1 + $0x18] ss:$28 sps:$4 sm:$0xff]   ;;  %v769_v14 = vld [vmem:[%s1055_s1 + $0x10] ss:$28 sps:$4 sm:$0xff]  }
  0x19   :  { %v386_v15 = vsel %vm381_vm0, %v772_v13, 0  ;;  %v22_v18 = vld [vmem:[%s1054_s0 + $0x30] sm:$0xff] }
  0x1b   :  { %416 = vmatpush1.bf16.xpose.msra.mxu0 %v715_v20  ;;  %457 = vmatpush1.bf16.xpose.msra.mxu1 %v716_v21  ;;  %v34_v20 = vpack.c.bf16 %v27_v17, %v20_v16  ;;  %v36_v21 = vpack.c.bf16 %v29_v19, %v22_v18 }
  0x1c   :  { %417 = vmatprep.subr.bf16.mxu0 %v717_v22  ;;  %458 = vmatprep.subr.bf16.mxu1 %v719_v23 }
  0x23   :  { %418 = vmatpush1.bf16.xpose.msra.mxu0 %v721_v24  ;;  %459 = vmatpush1.bf16.xpose.msra.mxu1 %v722_v25 }
  0x24   :  { %419 = vmatprep.subr.bf16.mxu0 %v723_v26  ;;  %460 = vmatprep.subr.bf16.mxu1 %v725_v27 }
  0x2b   :  { %420 = vmatpush1.bf16.xpose.msra.mxu0 %v727_v28  ;;  %461 = vmatpush1.bf16.xpose.msra.mxu1 %v728_v29 }
  0x2c   :  { %421 = vmatprep.subr.bf16.mxu0 %v729_v30  ;;  %462 = vmatprep.subr.bf16.mxu1 %v731_v31 }
  0x33   :  { %422 = vmatpush1.bf16.xpose.msra.mxu0 %v733_v32  ;;  %463 = vmatpush1.bf16.xpose.msra.mxu1 %v734_v33 }
  0x34   :  { %423 = vmatprep.subr.bf16.mxu0 %v735_v34  ;;  %464 = vmatprep.subr.bf16.mxu1 %v737_v35  ;;  %v658_v34 = vld [vmem:[%s1056_s2] ss:$0 sm:$0xff] }
  0x3b   :  { %424 = vmatpush1.bf16.xpose.msra.mxu0 %v739_v36  ;;  %465 = vmatpush1.bf16.xpose.msra.mxu1 %v740_v37 }
  0x3c   :  { %491 = vmatprep.subr.bf16.mxu0 %v743_v38  ;;  %668 = vmatprep.subr.bf16.mxu1 %v795_v43 }
  0x42   :  { %442 = vmatmul.mubr.bf16.vlgmr.msra.gmra.mxu0 %v30_v45  ;;  %483 = vmatmul.mubr.bf16.vlgmr.msra.gmra.mxu1 %v32_v48 }
  0x43   :  { %492 = vmatpush1.bf16.xpose.msra.mxu0 %v741_v49  ;;  %669 = vmatpush3.bf16.xpose.msra.mxu1 %v407_v51 }
  0x44   :  { %493 = vmatprep.subr.bf16.mxu0 %v747_v50  ;;  %670 = vmatprep.subr.bf16.mxu1 %v795_v43 }
  0x45   :  { %523 = vmatprep.mubr.bf16.mxu0 %v35_v52  ;;  %684 = vmatprep.mubr.msk.bf16.mxu1 %vm796_vm1, %v795_v43 }
  0x4b   :  { %494 = vmatpush1.bf16.xpose.msra.mxu0 %v745_v54  ;;  %671 = vmatpush3.bf16.xpose.msra.mxu1 %v404_v56 }
  0x4c   :  { %495 = vmatprep.subr.bf16.mxu0 %v751_v55  ;;  %672 = vmatprep.subr.bf16.mxu1 %v795_v43 }
  0x53   :  { %496 = vmatpush1.bf16.xpose.msra.mxu0 %v749_v58  ;;  %673 = vmatpush3.bf16.xpose.msra.mxu1 %v401_v60 }
  0x54   :  { %497 = vmatprep.subr.bf16.mxu0 %v755_v59  ;;  %674 = vmatprep.subr.bf16.mxu1 %v795_v43 }
  0x5b   :  { %498 = vmatpush1.bf16.xpose.msra.mxu0 %v753_v62  ;;  %675 = vmatpush3.bf16.xpose.msra.mxu1 %v398_v0 }
  0x5c   :  { %499 = vmatprep.subr.bf16.mxu0 %v759_v63  ;;  %676 = vmatprep.subr.bf16.mxu1 %v795_v43 }
  0x63   :  { %500 = vmatpush1.bf16.xpose.msra.mxu0 %v757_v2  ;;  %677 = vmatpush3.bf16.xpose.msra.mxu1 %v395_v4 }
  0x64   :  { %501 = vmatprep.subr.bf16.mxu0 %v763_v3  ;;  %678 = vmatprep.subr.bf16.mxu1 %v795_v43 }
  0x6b   :  { %502 = vmatpush1.bf16.xpose.msra.mxu0 %v761_v6  ;;  %679 = vmatpush3.bf16.xpose.msra.mxu1 %v392_v8 }
  0x6c   :  { %503 = vmatprep.subr.bf16.mxu0 %v767_v7  ;;  %680 = vmatprep.subr.bf16.mxu1 %v795_v43 }
  0x73   :  { %504 = vmatpush1.bf16.xpose.msra.mxu0 %v765_v10  ;;  %681 = vmatpush3.bf16.xpose.msra.mxu1 %v389_v12 }
  0x74   :  { %505 = vmatprep.subr.bf16.mxu0 %v771_v11  ;;  %682 = vmatprep.subr.bf16.mxu1 %v795_v43 }
  0x7b   :  { %506 = vmatpush1.bf16.xpose.msra.mxu0 %v769_v14  ;;  %683 = vmatpush3.bf16.xpose.msra.mxu1 %v386_v15 }
  0x82   :  { %524 = vmatmul.mubr.bf16.vlgmr.msra.gmra.mxu0 %v34_v20  ;;  %685 = vmatmul.mubr.msk.bf16.vlgmr.msra.gmra.mxu1 %vm381_vm0, %v36_v21 }
 0x102   :  { %v443_v22 = vpop.f32.mrf.mxu0  ;;  %v484_v23 = vpop.f32.mrf.mxu1 }
 0x103   :  { %v485_v30 = vadd.f32 %v484_v23, %v443_v22 }
 0x104   :  { %v445_v24 = vpop.f32.mrf.mxu0  ;;  %v486_v25 = vpop.f32.mrf.mxu1 }
 0x106   :  { %v446_v26 = vpop.f32.mrf.mxu0  ;;  %v487_v27 = vpop.f32.mrf.mxu1 }
 0x107   :  { %v488_v36 = vadd.f32 %v487_v27, %v446_v26 }
 0x108   :  { %v448_v28 = vpop.f32.mrf.mxu0  ;;  %v489_v29 = vpop.f32.mrf.mxu1 }
 0x142   :  { %v525_v31 = vpop.f32.mrf.mxu0  ;;  %v566_v33 = vpop.f32.mrf.mxu1 }
 0x143   :  { %v526_v32 = vadd.f32 %v525_v31, %v485_v30 }
 0x144   :  { %v527_v35 = vpop.f32.mrf.mxu0  ;;  %v686_v38 = vpop.f32.mrf.mxu1 }
 0x145   :  { %v567_v37 = vadd.f32 %v566_v33, %v526_v32 }
 0x146   :  { %v528_v39 = vpop.f32.mrf.mxu0  ;;  %v569_v42 = vpop.f32.mrf.mxu1 }
 0x147   :  { %v580_v40 = vadd.f32 %v658_v34, %v567_v37  ;;  %v529_v41 = vadd.f32 %v528_v39, %v488_v36 }
 0x148   :  { %v530_v43 = vpop.f32.mrf.mxu0  ;;  %v687_v45 = vpop.f32.mrf.mxu1 }
 0x149   :  { %583 = vst.msk [vmem:[#allocation2] sm:$0xff] %vm582_vm2, %v580_v40  ;;  %v570_v44 = vadd.f32 %v569_v42, %v529_v41 }
 0x14b   :  { %v581_v46 = vadd.f32 %v658_v34, %v570_v44 }
 0x14d   :  { %584 = vst.msk [vmem:[#allocation2 + $0x8] sm:$0xff] %vm582_vm2, %v581_v46 }
 0x14e   :  { %589 = vsyncadd [#allocation3], 128  ;;  %s797_s0 = smov [#allocation2]  }
 0x14f   :  { %s590_s18 = sshll.u32 %s797_s0, 4  ;;  %s591_s18 = int_to_ptr.vmem [resolvable:$true] %s590_s18 }
 0x150   :  { %s773_s2 = scalar_lea.vmem %s591_s18, 128  ;;  %s777_s19 = scalar_lea.vmem %s591_s18, 256 }
 0x151   :  { %p774_p0 = scmp.ne.s32.totalorder %s591_s18, %s773_s2  ;;  %p778_p1 = scmp.lt.s32.totalorder %s591_s18, %s591_s18 }
 0x152   :  { %p779_p2 = scmp.lt.s32.totalorder %s777_s19, %s773_s2 }
 0x154   :  { %p780_p3 = por %p779_p2, %p778_p1 }
 0x156   :  { %p781_p4 = pnand %p780_p3, %p774_p0 }
 0x158   :  { %784 = shalt.err (!%p781_p4)
}
 0x159   :  { %s798_s20 = smov 128   ;;  %s799_s21 = smov 8  }
 0x15a   :  { %596 = dma.vmem_to_hbm [thread:$0]  %s591_s18, 128, %s1057_s3, [#allocation3], %s798_s20, %s798_s20, %s799_s21  }
 0x15b   :  { %793 = dma.done.wait [#allocation3], 256  }
 0x15c   :  { %794 = vsyncadd [#allocation3], 4294967040 }
 0x15d   :  { %600 = vsyncpa [#allocation3], 1 }

</bundles_post_ra>
